<compile_context>
chip_gen: v7x
topology: tpu7x:2x2x1
jax: 0.10.0
libtpu: 0.0.40
codegen_flags: <defaults>
</compile_context>

<pallas_src>
import functools

import jax
import jax.numpy as jnp
from jax.experimental import pallas as pl
from jax.experimental.pallas import tpu as pltpu

WORLD_SIZE = 4                 # simulated FSDP world size (all shards on-device)
LANE = 128                     # feature dims padded to multiples of lane width
SUBLANE = 8                    # batch padded to a multiple of this
PARAM_DTYPE = jnp.bfloat16     # MXU-native matmul operand dtype
ACT_DTYPE = jnp.bfloat16       # inter-layer activation dtype (halves HBM traffic)


def _round_up(n, m):
    return (n + m - 1) // m * m


def _vmem_budget_bytes():
    """Generation-aware per-call VMEM budget (~3/4 of physical VMEM)."""
    try:
        cap = pltpu.get_tpu_info().vmem_capacity_bytes
    except Exception:
        cap = 64 * 1024 * 1024   # conservative fallback (v7x-sized)
    return (3 * cap) // 4        # v7x: ~48 MiB, v5e/v6e: ~96 MiB


def _split_for_two_cores(bp, tm, dout_p, tn):
    """Keep >= 2 parallel grid iterations when possible (v7x has 2 TCs/chip).

    On single-TC chips this only costs one extra (~0.35 us) grid step."""
    if (bp // tm) * (dout_p // tn) >= 2:
        return tm, tn
    if tm >= 2 * SUBLANE and bp % (tm // 2) == 0:
        return tm // 2, tn
    if tn >= 2 * LANE and dout_p % (tn // 2) == 0:
        return tm, tn // 2
    return tm, tn


def _plan_tiles(bp, din_p, dout_p, x_bytes, w_bytes, b_bytes, o_bytes,
                budget, force_ksplit=False, max_tk=None):
    """Pick (kind, tm, tn, tk).  Prefer collapsing K (whole weight in VMEM)."""
    tm_cands = [t for t in (512, 256, 128, 64, 32, 16, 8) if bp % t == 0] or [bp]
    tn_cands = [t for t in (512, 256, 128) if dout_p % t == 0] or [dout_p]
    tk_cands = [t for t in (2048, 1024, 512, 256, 128) if din_p % t == 0] or [din_p]
    if max_tk is not None:
        tk_cands = [t for t in tk_cands if t <= max_tk] or [min(tk_cands)]

    def fused_bytes(tm, tn):
        # double-buffered inputs + output (BlockSpec auto-pipelining)
        return 2 * (tm * din_p * x_bytes + din_p * tn * w_bytes
                    + tn * b_bytes + tm * tn * o_bytes)

    def ksplit_bytes(tm, tn, tk):
        return (2 * (tm * tk * x_bytes + tk * tn * w_bytes
                     + tn * b_bytes + tm * tn * o_bytes)
                + tm * tn * 4)   # f32 accumulator scratch

    if not force_ksplit:
        for tm in tm_cands:
            for tn in tn_cands:
                if fused_bytes(tm, tn) <= budget:
                    return "fused", tm, tn, din_p
    for tm in tm_cands:
        for tn in tn_cands:
            for tk in tk_cands:
                if ksplit_bytes(tm, tn, tk) <= budget:
                    return "ksplit", tm, tn, tk
    return "ksplit", tm_cands[-1], tn_cands[-1], tk_cands[-1]


# -----------------------------------------------------------------------------
# Sharding glue (mirrors shard_tensor): pad + evenly split into world_size
# shards.  Layout chosen so gather == reshape (no copy, no gather kernel).
# -----------------------------------------------------------------------------
def shard_linear_params(weight, bias, world_size=WORLD_SIZE):
    """weight: (Dout, Din) PyTorch nn.Linear layout, bias: (Dout,)."""
    dout, din = weight.shape
    din_p = _round_up(din, LANE)
    dout_p = _round_up(dout, LANE)
    assert din_p % world_size == 0 and dout_p % world_size == 0

    # Pre-transposed, zero-padded, bf16 weight (Din_p, Dout_p): consumed by a
    # plain last-dim-contraction matmul -- no in-kernel .T / XLU work.
    wt = jnp.zeros((din_p, dout_p), dtype=PARAM_DTYPE)
    wt = wt.at[:din, :dout].set(weight.T.astype(PARAM_DTYPE))
    # Row-shard along the 128-multiple Din_p axis: world_size | 128 | din_p.
    wt_shards = wt.reshape(world_size, din_p // world_size, dout_p)

    # Bias stays f32: it is added to the f32 accumulator and is tiny.
    b = jnp.zeros((dout_p,), dtype=jnp.float32).at[:dout].set(bias.astype(jnp.float32))
    b_shards = b.reshape(world_size, dout_p // world_size)

    meta = dict(din=din, dout=dout, din_p=din_p, dout_p=dout_p,
                world_size=world_size)
    return wt_shards, b_shards, meta


# -----------------------------------------------------------------------------
# Pallas kernels: Linear (+ optional ReLU), bf16 operands, f32 MXU accumulation.
# -----------------------------------------------------------------------------
def _linear_kernel_fused(x_ref, wt_ref, b_ref, o_ref, *, apply_relu):
    # Whole contraction in one shot: x (tm, Din_p) @ wt (Din_p, tn).
    y = jnp.dot(x_ref[...], wt_ref[...], preferred_element_type=jnp.float32)
    y = y + b_ref[...].astype(jnp.float32)          # (1, tn) broadcast
    if apply_relu:
        y = jnp.maximum(y, 0.0)
    o_ref[...] = y.astype(o_ref.dtype)


def _linear_kernel_ksplit(x_ref, wt_ref, b_ref, o_ref, acc_ref, *, apply_relu):
    @pl.when(pl.program_id(2) == 0)
    def _init():
        acc_ref[...] = jnp.zeros_like(acc_ref)

    acc_ref[...] += jnp.dot(x_ref[...], wt_ref[...],
                            preferred_element_type=jnp.float32)

    @pl.when(pl.program_id(2) == pl.num_programs(2) - 1)
    def _finalize():
        y = acc_ref[...] + b_ref[...].astype(jnp.float32)
        if apply_relu:
            y = jnp.maximum(y, 0.0)
        o_ref[...] = y.astype(o_ref.dtype)


def pallas_linear_padded(x_p, wt_p, b_p, *, apply_relu=False, out_dtype=None,
                         force_ksplit=False, max_tk=None):
    """x_p: (Bp, Din_p) bf16, wt_p: (Din_p, Dout_p) bf16, b_p: (1, Dout_p) f32."""
    bp, din_p = x_p.shape
    din_p2, dout_p = wt_p.shape
    assert din_p == din_p2 and b_p.shape == (1, dout_p)
    out_dtype = out_dtype if out_dtype is not None else x_p.dtype

    budget = _vmem_budget_bytes()
    kind, tm, tn, tk = _plan_tiles(
        bp, din_p, dout_p,
        jnp.dtype(x_p.dtype).itemsize, jnp.dtype(wt_p.dtype).itemsize,
        jnp.dtype(b_p.dtype).itemsize, jnp.dtype(out_dtype).itemsize,
        budget, force_ksplit=force_ksplit, max_tk=max_tk)
    tm, tn = _split_for_two_cores(bp, tm, dout_p, tn)

    if kind == "fused":
        kernel = functools.partial(_linear_kernel_fused, apply_relu=apply_relu)
        return pl.pallas_call(
            kernel,
            out_shape=jax.ShapeDtypeStruct((bp, dout_p), out_dtype),
            grid_spec=pltpu.PrefetchScalarGridSpec(
                num_scalar_prefetch=0,
                grid=(bp // tm, dout_p // tn),
                in_specs=[
                    pl.BlockSpec((tm, din_p), lambda i, j: (i, 0)),
                    pl.BlockSpec((din_p, tn), lambda i, j: (0, j)),
                    pl.BlockSpec((1, tn), lambda i, j: (0, j)),
                ],
                out_specs=pl.BlockSpec((tm, tn), lambda i, j: (i, j)),
            ),
            compiler_params=pltpu.CompilerParams(
                dimension_semantics=("parallel", "parallel"),
                vmem_limit_bytes=budget,
            ),
        )(x_p, wt_p, b_p)

    kernel = functools.partial(_linear_kernel_ksplit, apply_relu=apply_relu)
    return pl.pallas_call(
        kernel,
        out_shape=jax.ShapeDtypeStruct((bp, dout_p), out_dtype),
        grid_spec=pltpu.PrefetchScalarGridSpec(
            num_scalar_prefetch=0,
            grid=(bp // tm, dout_p // tn, din_p // tk),
            in_specs=[
                pl.BlockSpec((tm, tk), lambda i, j, k: (i, k)),
                pl.BlockSpec((tk, tn), lambda i, j, k: (k, j)),
                pl.BlockSpec((1, tn), lambda i, j, k: (0, j)),
            ],
            out_specs=pl.BlockSpec((tm, tn), lambda i, j, k: (i, j)),
            scratch_shapes=[pltpu.VMEM((tm, tn), jnp.float32)],
        ),
        compiler_params=pltpu.CompilerParams(
            dimension_semantics=("parallel", "parallel", "arbitrary"),
            vmem_limit_bytes=budget,
        ),
    )(x_p, wt_p, b_p)


# -----------------------------------------------------------------------------
# FSDPLayer / SimpleFSDP analogues
# -----------------------------------------------------------------------------
class FSDPLinearLayer:
    """FSDPLayer wrapping a Linear: shards params at init, gathers at forward."""

    def __init__(self, weight, bias, apply_relu=False):
        # shard_parameters()
        self.wt_shards, self.b_shards, self.meta = shard_linear_params(weight, bias)
        self.apply_relu = apply_relu

    def forward(self, x_padded, out_dtype=ACT_DTYPE):
        m = self.meta
        # gather_all_parameters(): contiguous leading-dim reshape == the
        # gathered full (padded) parameter; zero HBM copy, zero extra launch.
        wt_full = self.wt_shards.reshape(m["din_p"], m["dout_p"])
        b_full = self.b_shards.reshape(1, m["dout_p"])
        out = pallas_linear_padded(x_padded, wt_full, b_full,
                                   apply_relu=self.apply_relu,
                                   out_dtype=out_dtype)
        # free_params(): no-op under functional JAX.
        return out


class SimpleFSDP:
    def __init__(self, layers):
        self.layers = layers  # _wrap_layers: every param-bearing child wrapped

    def forward(self, x):
        b, din = x.shape
        bp = _round_up(b, SUBLANE)
        din_p = self.layers[0].meta["din_p"]
        # Pad once on entry (bf16 activations); padded feature lanes stay zero
        # through every layer (zero-padded weights/bias, relu(0)=0); trim once
        # on exit.  NOTE: padded *batch* rows pick up bias and are only removed
        # by the final trim -- fine for this forward, but any fused batch
        # reduction would need masking.
        x_p = jnp.zeros((bp, din_p), dtype=ACT_DTYPE).at[:b, :din].set(
            x.astype(ACT_DTYPE))
        n = len(self.layers)
        for idx, layer in enumerate(self.layers):
            last = idx == n - 1
            x_p = layer.forward(x_p,
                                out_dtype=(jnp.float32 if last else ACT_DTYPE))
        dout = self.layers[-1].meta["dout"]
        return x_p[:b, :dout]


# -----------------------------------------------------------------------------
# Demo / check
# -----------------------------------------------------------------------------
if __name__ == "__main__":
    B, D_IN, D_HID, D_OUT = 8, 32, 64, 16

    key = jax.random.PRNGKey(0)
    kx, kw1, kb1, kw2, kb2, kx2, kw3 = jax.random.split(key, 7)

    x = jax.random.normal(kx, (B, D_IN), dtype=jnp.float32)
    w1 = jax.random.normal(kw1, (D_HID, D_IN), dtype=jnp.float32) * 0.1
    b1 = jax.random.normal(kb1, (D_HID,), dtype=jnp.float32) * 0.1
    w2 = jax.random.normal(kw2, (D_OUT, D_HID), dtype=jnp.float32) * 0.1
    b2 = jax.random.normal(kb2, (D_OUT,), dtype=jnp.float32) * 0.1

    model = SimpleFSDP([
        FSDPLinearLayer(w1, b1, apply_relu=True),   # Linear(32, 64) + ReLU
        FSDPLinearLayer(w2, b2, apply_relu=False),  # Linear(64, 16)
    ])

    forward = jax.jit(model.forward)
    out = jax.block_until_ready(forward(x))

    # Reference emulating the kernel numerics exactly: bf16 operands,
    # f32 accumulation, bf16 inter-layer activation.
    def f32dot(a, b):
        return jnp.dot(a.astype(jnp.bfloat16).astype(jnp.float32),
                       b.astype(jnp.bfloat16).astype(jnp.float32),
                       precision=jax.lax.Precision.HIGHEST)

    h = jnp.maximum(f32dot(x, w1.T) + b1, 0.0)
    h = h.astype(jnp.bfloat16).astype(jnp.float32)
    ref = f32dot(h, w2.T) + b2

    assert out.shape == (B, D_OUT)
    assert out.dtype == jnp.float32
    assert jnp.allclose(out, ref, atol=2e-3, rtol=2e-3), "mismatch vs reference"

    # Also exercise the K-split (accumulator) fallback kernel path.
    x2 = (jax.random.normal(kx2, (8, 256), dtype=jnp.float32)).astype(jnp.bfloat16)
    w3 = (jax.random.normal(kw3, (256, 128), dtype=jnp.float32) * 0.1
          ).astype(jnp.bfloat16)
    b3 = jnp.zeros((1, 128), dtype=jnp.float32)
    out2 = jax.block_until_ready(
        pallas_linear_padded(x2, w3, b3, apply_relu=True,
                             out_dtype=jnp.float32,
                             force_ksplit=True, max_tk=128))
    ref2 = jnp.maximum(
        jnp.dot(x2.astype(jnp.float32), w3.astype(jnp.float32),
                precision=jax.lax.Precision.HIGHEST), 0.0)
    assert jnp.allclose(out2, ref2, atol=2e-3, rtol=2e-3), "ksplit mismatch"

    print("KERNEL_OK")
</pallas_src>

<mosaic_0001>
module attributes {stable_mosaic.version = 11 : i64} {
  func.func @_linear_kernel_fused(%arg0: i32, %arg1: i32, %arg2: memref<8x128xbf16, #tpu.memory_space<vmem>>, %arg3: memref<128x128xbf16, #tpu.memory_space<vmem>>, %arg4: memref<1x128xf32, #tpu.memory_space<vmem>>, %arg5: memref<8x128xbf16, #tpu.memory_space<vmem>>) attributes {dimension_semantics = [#tpu.dimension_semantics<parallel>, #tpu.dimension_semantics<parallel>], iteration_bounds = array<i64: 1, 1>, scalar_prefetch = 0 : i64, scratch_operands = 0 : i64, tpu.core_type = #tpu.core_type<tc>, window_params = [{transform_indices = @transform_0, window_bounds = array<i64: 8, 128>}, {transform_indices = @transform_1, window_bounds = array<i64: 128, 128>}, {transform_indices = @transform_2, window_bounds = array<i64: 1, 128>}, {transform_indices = @transform_3, window_bounds = array<i64: 8, 128>}]} {
    %c0 = arith.constant 0 : index
    %c0_0 = arith.constant 0 : index
    %0 = vector.load %arg2[%c0, %c0_0] : memref<8x128xbf16, #tpu.memory_space<vmem>>, vector<8x128xbf16>
    %c0_1 = arith.constant 0 : index
    %c0_2 = arith.constant 0 : index
    %1 = vector.load %arg3[%c0_1, %c0_2] : memref<128x128xbf16, #tpu.memory_space<vmem>>, vector<128x128xbf16>
    %cst = arith.constant dense<0.000000e+00> : vector<8x128xf32>
    %2 = tpu.matmul %0, %1, %cst {dimension_numbers = #tpu.dot_dimension_numbers<[1], [0], [0], [1], [0, 0, 1, 1], [], []>} : vector<8x128xbf16>, vector<128x128xbf16>, vector<8x128xf32> -> vector<8x128xf32>
    %c0_3 = arith.constant 0 : index
    %c0_4 = arith.constant 0 : index
    %3 = vector.load %arg4[%c0_3, %c0_4] : memref<1x128xf32, #tpu.memory_space<vmem>>, vector<1x128xf32>
    %4 = vector.broadcast %3 : vector<1x128xf32> to vector<8x128xf32>
    %5 = arith.addf %2, %4 : vector<8x128xf32>
    %cst_5 = arith.constant 0.000000e+00 : f32
    %6 = vector.broadcast %cst_5 : f32 to vector<8x128xf32>
    %7 = arith.maximumf %5, %6 : vector<8x128xf32>
    %8 = arith.truncf %7 : vector<8x128xf32> to vector<8x128xbf16>
    %c0_6 = arith.constant 0 : index
    %c0_7 = arith.constant 0 : index
    %9 = vector.load %arg5[%c0_6, %c0_7] : memref<8x128xbf16, #tpu.memory_space<vmem>>, vector<8x128xbf16>
    tpu.vector_store %arg5[%c0_6, %c0_7], %8 {strides = array<i32>} : memref<8x128xbf16, #tpu.memory_space<vmem>>, vector<8x128xbf16>,
    return
  }
  func.func @transform_0(%arg0: i32, %arg1: i32) -> (i32, i32) {
    %c0_i32 = arith.constant 0 : i32
    %c0_i32_0 = arith.constant 0 : i32
    return %arg0, %c0_i32 : i32, i32
  }
  func.func @transform_1(%arg0: i32, %arg1: i32) -> (i32, i32) {
    %c0_i32 = arith.constant 0 : i32
    %c0_i32_0 = arith.constant 0 : i32
    return %c0_i32, %arg1 : i32, i32
  }
  func.func @transform_2(%arg0: i32, %arg1: i32) -> (i32, i32) {
    %c0_i32 = arith.constant 0 : i32
    %c0_i32_0 = arith.constant 0 : i32
    return %c0_i32, %arg1 : i32, i32
  }
  func.func @transform_3(%arg0: i32, %arg1: i32) -> (i32, i32) {
    %c0_i32 = arith.constant 0 : i32
    return %arg0, %arg1 : i32, i32
  }
}

module attributes {stable_mosaic.version = 11 : i64} {
  func.func @_linear_kernel_fused(%arg0: i32, %arg1: i32, %arg2: memref<8x128xbf16, #tpu.memory_space<vmem>>, %arg3: memref<128x128xbf16, #tpu.memory_space<vmem>>, %arg4: memref<1x128xf32, #tpu.memory_space<vmem>>, %arg5: memref<8x128xf32, #tpu.memory_space<vmem>>) attributes {dimension_semantics = [#tpu.dimension_semantics<parallel>, #tpu.dimension_semantics<parallel>], iteration_bounds = array<i64: 1, 1>, scalar_prefetch = 0 : i64, scratch_operands = 0 : i64, tpu.core_type = #tpu.core_type<tc>, window_params = [{transform_indices = @transform_0, window_bounds = array<i64: 8, 128>}, {transform_indices = @transform_1, window_bounds = array<i64: 128, 128>}, {transform_indices = @transform_2, window_bounds = array<i64: 1, 128>}, {transform_indices = @transform_3, window_bounds = array<i64: 8, 128>}]} {
    %c0 = arith.constant 0 : index
    %c0_0 = arith.constant 0 : index
    %0 = vector.load %arg2[%c0, %c0_0] : memref<8x128xbf16, #tpu.memory_space<vmem>>, vector<8x128xbf16>
    %c0_1 = arith.constant 0 : index
    %c0_2 = arith.constant 0 : index
    %1 = vector.load %arg3[%c0_1, %c0_2] : memref<128x128xbf16, #tpu.memory_space<vmem>>, vector<128x128xbf16>
    %cst = arith.constant dense<0.000000e+00> : vector<8x128xf32>
    %2 = tpu.matmul %0, %1, %cst {dimension_numbers = #tpu.dot_dimension_numbers<[1], [0], [0], [1], [0, 0, 1, 1], [], []>} : vector<8x128xbf16>, vector<128x128xbf16>, vector<8x128xf32> -> vector<8x128xf32>
    %c0_3 = arith.constant 0 : index
    %c0_4 = arith.constant 0 : index
    %3 = vector.load %arg4[%c0_3, %c0_4] : memref<1x128xf32, #tpu.memory_space<vmem>>, vector<1x128xf32>
    %4 = vector.broadcast %3 : vector<1x128xf32> to vector<8x128xf32>
    %5 = arith.addf %2, %4 : vector<8x128xf32>
    %c0_5 = arith.constant 0 : index
    %c0_6 = arith.constant 0 : index
    %6 = vector.load %arg5[%c0_5, %c0_6] : memref<8x128xf32, #tpu.memory_space<vmem>>, vector<8x128xf32>
    tpu.vector_store %arg5[%c0_5, %c0_6], %5 {strides = array<i32>} : memref<8x128xf32, #tpu.memory_space<vmem>>, vector<8x128xf32>,
    return
  }
  func.func @transform_0(%arg0: i32, %arg1: i32) -> (i32, i32) {
    %c0_i32 = arith.constant 0 : i32
    %c0_i32_0 = arith.constant 0 : i32
    return %arg0, %c0_i32 : i32, i32
  }
  func.func @transform_1(%arg0: i32, %arg1: i32) -> (i32, i32) {
    %c0_i32 = arith.constant 0 : i32
    %c0_i32_0 = arith.constant 0 : i32
    return %c0_i32, %arg1 : i32, i32
  }
  func.func @transform_2(%arg0: i32, %arg1: i32) -> (i32, i32) {
    %c0_i32 = arith.constant 0 : i32
    %c0_i32_0 = arith.constant 0 : i32
    return %c0_i32, %arg1 : i32, i32
  }
  func.func @transform_3(%arg0: i32, %arg1: i32) -> (i32, i32) {
    %c0_i32 = arith.constant 0 : i32
    return %arg0, %arg1 : i32, i32
  }
}

</mosaic_0001>

<bundles_post_ra>
// kernel: forward.2
= control target key start
LH: loop header
LB: loop body
LE: loop exit
PB: predicated region body
PF: predicated region fallthrough
CT: control target
= control target key end

     0   :  { %8 = vsyncpa [#allocation3], 0  ;;  %s318_s0 = inlined_call_operand.vmem [shape: bf16[8,128], index: 0, kind: input, shape index: {}]   ;;  %s319_s1 = inlined_call_operand.hbm [shape: bf16[128,128], index: 1, kind: input, shape index: {}]   ;;  %s320_s2 = inlined_call_operand.hbm [shape: f32[1,128], index: 2, kind: input, shape index: {}]   ;;  %s321_s3 = inlined_call_operand.vmem [shape: bf16[8,128], index: 3, kind: output, shape index: {}]  }
   0x1   :  { %9 = vsyncpa [#allocation5], 0  ;;  %s262_s12 = smov [#allocation2]   ;;  %s214_s16 = scalar_lea.hbm %s319_s1, 1024 }
   0x2   :  { %s17_s13 = sshll.u32 %s262_s12, 4  ;;  %p215_p0 = scmp.ne.s32.totalorder %s319_s1, %s214_s16  ;;  %s18_s13 = int_to_ptr.vmem [resolvable:$true] %s17_s13 }
   0x3   :  { %p218_p1 = scmp.lt.u32.totalorder %s214_s16, %s319_s1 }
   0x5   :  { %p220_p2 = pnand %p218_p1, %p215_p0 }
   0x7   :  { %223 = shalt.err (!%p220_p2)
}
   0x8   :  { %s224_s21 = scalar_lea.vmem %s18_s13, 1024  ;;  %p229_p4 = scmp.lt.s32.totalorder %s18_s13, %s18_s13 }
   0x9   :  { %p225_p3 = scmp.ne.s32.totalorder %s18_s13, %s224_s21  ;;  %p230_p5 = scmp.lt.s32.totalorder %s224_s21, %s224_s21 }
   0xb   :  { %p231_p6 = por %p230_p5, %p229_p4 }
   0xd   :  { %p232_p7 = pnand %p231_p6, %p225_p3 }
   0xf   :  { %235 = shalt.err (!%p232_p7)
}
  0x10   :  { %s263_s22 = smov 64   ;;  %s264_s23 = smov 4  }
  0x11   :  { %23 = dma.hbm_to_vmem [thread:$0]  %s319_s1, 1024, %s18_s13, [#allocation3], %s263_s22, %s263_s22, %s264_s23  }
  0x12   :  { %s265_s26 = smov [#allocation4]   ;;  %s236_s30 = scalar_lea.hbm %s320_s2, 16 }
  0x13   :  { %s30_s27 = sshll.u32 %s265_s26, 4  ;;  %p237_p8 = scmp.ne.s32.totalorder %s320_s2, %s236_s30  ;;  %s31_s27 = int_to_ptr.vmem [resolvable:$true] %s30_s27 }
  0x14   :  { %p240_p9 = scmp.lt.u32.totalorder %s236_s30, %s320_s2 }
  0x16   :  { %p242_p10 = pnand %p240_p9, %p237_p8 }
  0x18   :  { %245 = shalt.err (!%p242_p10)
}
  0x19   :  { %s246_s8 = scalar_lea.vmem %s31_s27, 16  ;;  %s250_s1 = scalar_lea.vmem %s31_s27, 32 }
  0x1a   :  { %p247_p11 = scmp.ne.s32.totalorder %s31_s27, %s246_s8  ;;  %p251_p12 = scmp.lt.s32.totalorder %s31_s27, %s31_s27 }
  0x1b   :  { %p252_p13 = scmp.lt.s32.totalorder %s250_s1, %s246_s8 }
  0x1d   :  { %p253_p0 = por %p252_p13, %p251_p12 }
  0x1f   :  { %p254_p1 = pnand %p253_p0, %p247_p11 }
  0x21   :  { %257 = shalt.err (!%p254_p1)
}
  0x22   :  { %33 = dma.hbm_to_vmem [thread:$0]  %s320_s2, 16, %s31_s27, [#allocation5]  }
  0x23   :  { %258 = dma.done.wait [#allocation3], 1024  }
  0x24   :  { %259 = vsyncadd [#allocation3], 4294966272 }
  0x25   :  { %260 = dma.done.wait [#allocation5], 16  }
  0x26   :  { %261 = vsyncadd [#allocation5], 4294967280  ;;  %v266_v0 = vmov 0.0   ;;  %vm267_vm0 = vmmov 0   ;;  %v206_v1 = vld [vmem:[#allocation2] sm:$0xff]   ;;  %v207_v2 = vld [vmem:[#allocation2 + $0x8] sm:$0xff]  }
  0x27   :  { %180 = vmatprep.subr.bf16.mxu0 %v266_v0  ;;  %196 = vmatprep.mubr.msk.bf16.mxu0 %vm267_vm0, %v266_v0  ;;  %v208_v3 = vld [vmem:[#allocation2 + $0x10] sm:$0xff]   ;;  %v209_v4 = vld [vmem:[#allocation2 + $0x18] sm:$0xff]   ;;  %v210_v5 = vld [vmem:[#allocation2 + $0x20] sm:$0xff]  }
  0x28   :  { %181 = vmatpush3.bf16.msra.mxu0 %v206_v1  ;;  %v211_v6 = vld [vmem:[#allocation2 + $0x28] sm:$0xff]   ;;  %v212_v7 = vld [vmem:[#allocation2 + $0x30] sm:$0xff]   ;;  %v213_v8 = vld [vmem:[#allocation2 + $0x38] sm:$0xff]  }
  0x29   :  { %182 = vmatprep.subr.bf16.mxu0 %v266_v0  ;;  %v41_v9 = vld [vmem:[%s318_s0] sm:$0xf] }
  0x2a   :  { %v162_v10 = vld [vmem:[#allocation4] ss:$0 sm:$0xff] }
  0x2c   :  { %183 = vmatpush3.bf16.msra.mxu0 %v207_v2 }
  0x2d   :  { %184 = vmatprep.subr.bf16.mxu0 %v266_v0 }
  0x30   :  { %185 = vmatpush3.bf16.msra.mxu0 %v208_v3 }
  0x31   :  { %186 = vmatprep.subr.bf16.mxu0 %v266_v0 }
  0x34   :  { %187 = vmatpush3.bf16.msra.mxu0 %v209_v4 }
  0x35   :  { %188 = vmatprep.subr.bf16.mxu0 %v266_v0 }
  0x38   :  { %189 = vmatpush3.bf16.msra.mxu0 %v210_v5 }
  0x39   :  { %190 = vmatprep.subr.bf16.mxu0 %v266_v0 }
  0x3c   :  { %191 = vmatpush3.bf16.msra.mxu0 %v211_v6 }
  0x3d   :  { %192 = vmatprep.subr.bf16.mxu0 %v266_v0 }
  0x40   :  { %193 = vmatpush3.bf16.msra.mxu0 %v212_v7 }
  0x41   :  { %194 = vmatprep.subr.bf16.mxu0 %v266_v0 }
  0x44   :  { %195 = vmatpush3.bf16.msra.mxu0 %v213_v8 }
  0x47   :  { %197 = vmatmul.mubr.bf16.vlgmr.msra.gmra.mrb[0].mxu0 %v41_v9 }
 0x11a   :  { %v147_v11 = vpop.f32.mrb[0].mxu0 }
 0x11b   :  { %v148_v12 = vadd.f32 %v162_v10, %v147_v11  ;;  %v198_v13 = vpop.f32.mrb[1].mxu0 }
 0x11c   :  { %v150_v14 = vpop.f32.mrb[2].mxu0 }
 0x11d   :  { %v153_v15 = vmax.f32 %v148_v12, 0.0  ;;  %v199_v16 = vpop.f32.mrb[3].mxu0 }
 0x11f   :  { %v154_v17 = vpack.c.bf16 %v153_v15, %v153_v15 }
 0x121   :  { %155 = vst [vmem:[%s321_s3] sm:$0xf] %v154_v17 }
 0x122   :  { %160 = vsyncpa [#allocation3], 1 }
 0x123   :  { %161 = vsyncpa [#allocation5], 1 }

// kernel: forward.3
= control target key start
LH: loop header
LB: loop body
LE: loop exit
PB: predicated region body
PF: predicated region fallthrough
CT: control target
= control target key end

     0   :  { %v216_v1 = vmov 0.0   ;;  %vm217_vm0 = vmmov 0   ;;  %s281_s0 = inlined_call_operand.vmem [shape: bf16[8,128], index: 0, kind: input, shape index: {}]   ;;  %s282_s1 = inlined_call_operand.vmem [shape: bf16[128,128], index: 1, kind: input, shape index: {}]   ;;  %s283_s2 = inlined_call_operand.vmem [shape: f32[1,128], index: 2, kind: input, shape index: {}]   ;;  %s284_s3 = inlined_call_operand.hbm [shape: f32[8,128], index: 3, kind: output, shape index: {}]  }
   0x1   :  { %v184_v0 = vld [vmem:[%s282_s1] sm:$0xff]   ;;  %161 = vmatprep.subr.bf16.mxu0 %v216_v1  ;;  %v185_v2 = vld [vmem:[%s282_s1 + $0x8] sm:$0xff]   ;;  %177 = vmatprep.mubr.msk.bf16.mxu0 %vm217_vm0, %v216_v1  ;;  %v186_v3 = vld [vmem:[%s282_s1 + $0x10] sm:$0xff]  }
   0x2   :  { %162 = vmatpush3.bf16.msra.mxu0 %v184_v0 }
   0x3   :  { %163 = vmatprep.subr.bf16.mxu0 %v216_v1 }
   0x6   :  { %164 = vmatpush3.bf16.msra.mxu0 %v185_v2 }
   0x7   :  { %165 = vmatprep.subr.bf16.mxu0 %v216_v1 }
   0x8   :  { %8 = vsyncpa [#allocation3], 0  ;;  %v187_v4 = vld [vmem:[%s282_s1 + $0x18] sm:$0xff]   ;;  %v188_v5 = vld [vmem:[%s282_s1 + $0x20] sm:$0xff]   ;;  %s218_s5 = smov [#allocation2]  }
   0x9   :  { %v189_v6 = vld [vmem:[%s282_s1 + $0x28] sm:$0xff]   ;;  %v190_v7 = vld [vmem:[%s282_s1 + $0x30] sm:$0xff]   ;;  %v191_v8 = vld [vmem:[%s282_s1 + $0x38] sm:$0xff]   ;;  %s135_s6 = sshll.u32 %s218_s5, 4  ;;  %s136_s6 = int_to_ptr.vmem [resolvable:$true] %s135_s6 }
   0xa   :  { %166 = vmatpush3.bf16.msra.mxu0 %v186_v3  ;;  %v16_v9 = vld [vmem:[%s281_s0] sm:$0xf]  ;;  %s192_s1 = scalar_lea.vmem %s136_s6, 128  ;;  %p197_p1 = scmp.lt.s32.totalorder %s136_s6, %s136_s6 }
   0xb   :  { %167 = vmatprep.subr.bf16.mxu0 %v216_v1  ;;  %v143_v10 = vld [vmem:[%s283_s2] ss:$0 sm:$0xff]  ;;  %p193_p0 = scmp.ne.s32.totalorder %s136_s6, %s192_s1  ;;  %p198_p2 = scmp.lt.s32.totalorder %s192_s1, %s192_s1 }
   0xd   :  { %p199_p3 = por %p198_p2, %p197_p1 }
   0xe   :  { %168 = vmatpush3.bf16.msra.mxu0 %v187_v4 }
   0xf   :  { %169 = vmatprep.subr.bf16.mxu0 %v216_v1  ;;  %p200_p4 = pnand %p199_p3, %p193_p0 }
  0x12   :  { %170 = vmatpush3.bf16.msra.mxu0 %v188_v5 }
  0x13   :  { %171 = vmatprep.subr.bf16.mxu0 %v216_v1 }
  0x16   :  { %172 = vmatpush3.bf16.msra.mxu0 %v189_v6 }
  0x17   :  { %173 = vmatprep.subr.bf16.mxu0 %v216_v1 }
  0x1a   :  { %174 = vmatpush3.bf16.msra.mxu0 %v190_v7 }
  0x1b   :  { %175 = vmatprep.subr.bf16.mxu0 %v216_v1 }
  0x1e   :  { %176 = vmatpush3.bf16.msra.mxu0 %v191_v8 }
  0x21   :  { %178 = vmatmul.mubr.bf16.vlgmr.msra.gmra.mrb[0].mxu0 %v16_v9 }
  0xf4   :  { %v122_v11 = vpop.f32.mrb[0].mxu0 }
  0xf5   :  { %v123_v12 = vadd.f32 %v143_v10, %v122_v11  ;;  %v179_v13 = vpop.f32.mrb[1].mxu0 }
  0xf6   :  { %v125_v14 = vpop.f32.mrb[2].mxu0 }
  0xf7   :  { %128 = vst [vmem:[#allocation2] sm:$0xff] %v123_v12  ;;  %v180_v15 = vpop.f32.mrb[3].mxu0 }
  0xf8   :  { %203 = shalt.err (!%p200_p4)
}
  0xf9   :  { %s204_s2 = scalar_lea.hbm %s284_s3, 128 }
  0xfa   :  { %p205_p5 = scmp.ne.s32.totalorder %s284_s3, %s204_s2  ;;  %p208_p6 = scmp.lt.u32.totalorder %s204_s2, %s284_s3 }
  0xfc   :  { %p210_p7 = pnand %p208_p6, %p205_p5 }
  0xfe   :  { %213 = shalt.err (!%p210_p7)
}
  0xff   :  { %138 = dma.vmem_to_hbm [thread:$0]  %s136_s6, 128, %s284_s3, [#allocation3]  }
 0x100   :  { %214 = dma.done.wait [#allocation3], 128  }
 0x101   :  { %215 = vsyncadd [#allocation3], 4294967168 }
 0x102   :  { %142 = vsyncpa [#allocation3], 1 }

</bundles_post_ra>
